<compile_context>
chip_gen: v5e
topology: v5e:2x2
jax: 0.10.0
libtpu: 0.0.40
codegen_flags: <defaults>
</compile_context>

<pallas_src>
import functools

import jax
import jax.numpy as jnp
from jax.experimental import pallas as pl
from jax.experimental.pallas import tpu as pltpu


def lstm_kernel(x_ref, w_ih_ref, w_hh_ref, b_ref, w_fc_ref, b_fc_ref, out_ref,
                *, seq_len, batch, hidden):
    B, H = batch, hidden

    # ---- prologue: batched input projection for every time step ----------
    # (S*B, D_in)bf16 @ (D_in, 4H)bf16 -> f32, + (1, 4H)f32.  One MXU matmul,
    # kept as a value (one (8,128) f32 vreg) -- no scratch round-trip.
    x_b = x_ref[...].astype(jnp.bfloat16)
    gx = jnp.dot(x_b, w_ih_ref[...],
                 preferred_element_type=jnp.float32) + b_ref[...]

    w_hh = w_hh_ref[...]                      # (H, 4H) bf16; hoisted

    # ---- recurrence: only h-dependent work on the serial path -------------
    h = jnp.zeros((B, H), jnp.bfloat16)       # init_hidden(): zeros
    c = jnp.zeros((B, H), jnp.float32)
    hs = []
    for t in range(seq_len):                  # fully unrolled (seq_len static)
        gates = gx[t * B:(t + 1) * B, :] + jnp.dot(
            h, w_hh, preferred_element_type=jnp.float32)        # (B, 4H) f32
        # PyTorch gate order along 4H: [i, f, g, o].
        # Apply sigmoid/tanh once over the full 128-lane vreg, then slice.
        sig = jax.nn.sigmoid(gates)
        tnh = jnp.tanh(gates)
        i_g = sig[:, 0 * H:1 * H]
        f_g = sig[:, 1 * H:2 * H]
        g_g = tnh[:, 2 * H:3 * H]
        o_g = sig[:, 3 * H:4 * H]
        c = f_g * c + i_g * g_g                                  # f32 VPU
        h_f32 = o_g * jnp.tanh(c)
        h = h_f32.astype(jnp.bfloat16)        # bf16 only as an MXU operand
        hs.append(h)

    # ---- epilogue: fused fc over all steps, one matmul + one store --------
    h_hist = jnp.concatenate(hs, axis=0)      # (S*B, H) bf16
    out_ref[...] = (
        jnp.dot(h_hist, w_fc_ref[...], preferred_element_type=jnp.float32)
        + b_fc_ref[...])


def prepare_params(params):
    """One-time weight prep (hoisted out of the per-call hot path).

    Transposes to row-major matmul layout, combines the two LSTM biases and
    casts the matmul operands to bf16 (single-pass MXU).  Biases stay f32.
    """
    w_ih, w_hh, b_ih, b_hh, w_fc, b_fc = params
    H = w_hh.shape[1]
    D_out = w_fc.shape[0]
    return (
        jnp.asarray(w_ih.T, jnp.bfloat16),                     # (D_in, 4H)
        jnp.asarray(w_hh.T, jnp.bfloat16),                     # (H, 4H)
        jnp.asarray((b_ih + b_hh).reshape(1, 4 * H), jnp.float32),
        jnp.asarray(w_fc.T, jnp.bfloat16),                     # (H, D_out)
        jnp.asarray(b_fc.reshape(1, D_out), jnp.float32),
    )


@functools.partial(jax.jit, static_argnames=("out_ch", "out_shape"))
def lstm_pallas(x, prepared, out_ch, out_shape):
    """x: (seq_len, B, in_ch, *in_shape) -> (seq_len, B, out_ch, *out_shape)"""
    w_ih_t, w_hh_t, b_comb, w_fc_t, b_fc2 = prepared
    seq_len, B = x.shape[0], x.shape[1]
    x2 = x.reshape(seq_len * B, -1).astype(jnp.float32)        # (S*B, D_in)
    H = w_hh_t.shape[0]
    D_out = w_fc_t.shape[1]

    kernel = functools.partial(
        lstm_kernel, seq_len=seq_len, batch=B, hidden=H)

    out = pl.pallas_call(
        kernel,
        out_shape=jax.ShapeDtypeStruct((seq_len * B, D_out), jnp.float32),
        in_specs=[pl.BlockSpec(memory_space=pltpu.MemorySpace.VMEM)] * 6,
        out_specs=pl.BlockSpec(memory_space=pltpu.MemorySpace.VMEM),
    )(x2, w_ih_t, w_hh_t, b_comb, w_fc_t, b_fc2)

    return out.reshape((seq_len, B, out_ch) + tuple(out_shape))


def lstm_reference(x, params, out_ch, out_shape):
    """Pure-JAX f32 reference matching nn.LSTM + nn.Linear semantics."""
    w_ih, w_hh, b_ih, b_hh, w_fc, b_fc = params
    seq_len, B = x.shape[0], x.shape[1]
    x2 = x.reshape(seq_len, B, -1).astype(jnp.float32)
    H = w_hh.shape[1]

    def step(carry, x_t):
        h, c = carry
        gates = x_t @ w_ih.T + h @ w_hh.T + b_ih + b_hh
        i_g = jax.nn.sigmoid(gates[:, 0 * H:1 * H])
        f_g = jax.nn.sigmoid(gates[:, 1 * H:2 * H])
        g_g = jnp.tanh(gates[:, 2 * H:3 * H])
        o_g = jax.nn.sigmoid(gates[:, 3 * H:4 * H])
        c_new = f_g * c + i_g * g_g
        h_new = o_g * jnp.tanh(c_new)
        return (h_new, c_new), h_new

    h0 = jnp.zeros((B, H), jnp.float32)
    c0 = jnp.zeros((B, H), jnp.float32)
    _, hs = jax.lax.scan(step, (h0, c0), x2)
    y = hs.reshape(seq_len * B, H) @ w_fc.T + b_fc
    return y.reshape((seq_len, B, out_ch) + tuple(out_shape))


if __name__ == "__main__":
    # Module config: LSTM(in_shape=16, in_ch=3, hidden_size=32, out_shape=1, out_ch=3)
    in_shape = (16,)
    in_ch = 3
    hidden_size = 32
    out_shape = (1,)
    out_ch = 3
    seq_len = 8
    B = 1  # init_hidden() hardcodes batch=1

    in_size = in_ch * int(jnp.prod(jnp.array(in_shape)))
    out_size = out_ch * int(jnp.prod(jnp.array(out_shape)))

    key = jax.random.PRNGKey(0)
    k = jax.random.split(key, 7)
    scale = 1.0 / jnp.sqrt(hidden_size)
    w_ih = jax.random.uniform(k[0], (4 * hidden_size, in_size),
                              jnp.float32, -scale, scale)
    w_hh = jax.random.uniform(k[1], (4 * hidden_size, hidden_size),
                              jnp.float32, -scale, scale)
    b_ih = jax.random.uniform(k[2], (4 * hidden_size,), jnp.float32, -scale, scale)
    b_hh = jax.random.uniform(k[3], (4 * hidden_size,), jnp.float32, -scale, scale)
    w_fc = jax.random.uniform(k[4], (out_size, hidden_size),
                              jnp.float32, -scale, scale)
    b_fc = jax.random.uniform(k[5], (out_size,), jnp.float32, -scale, scale)
    params = (w_ih, w_hh, b_ih, b_hh, w_fc, b_fc)

    x = jax.random.normal(k[6], (seq_len, B, in_ch) + in_shape, jnp.float32)

    # One-time weight preparation (not in the per-call hot path).
    prepared = prepare_params(params)
    prepared = jax.block_until_ready(prepared)

    out = lstm_pallas(x, prepared, out_ch, out_shape)
    out = jax.block_until_ready(out)

    ref = lstm_reference(x, params, out_ch, out_shape)
    assert out.shape == (seq_len, B, out_ch) + out_shape, out.shape
    # bf16 MXU operands (f32 accumulate / gate math): tolerance loosened
    # accordingly vs. the pure-f32 reference.
    assert jnp.allclose(out, ref, atol=2e-2, rtol=2e-2), \
        float(jnp.max(jnp.abs(out - ref)))

    print("KERNEL_OK")
</pallas_src>

<mosaic_0001>
module attributes {stable_mosaic.version = 11 : i64} {
  func.func @lstm_kernel(%arg0: memref<8x48xf32, #tpu.memory_space<vmem>>, %arg1: memref<48x128xbf16, #tpu.memory_space<vmem>>, %arg2: memref<32x128xbf16, #tpu.memory_space<vmem>>, %arg3: memref<1x128xf32, #tpu.memory_space<vmem>>, %arg4: memref<32x3xbf16, #tpu.memory_space<vmem>>, %arg5: memref<1x3xf32, #tpu.memory_space<vmem>>, %arg6: memref<8x3xf32, #tpu.memory_space<vmem>>) attributes {dimension_semantics = [], scalar_prefetch = 0 : i64, scratch_operands = 0 : i64, tpu.core_type = #tpu.core_type<tc>} {
    %c0 = arith.constant 0 : index
    %c0_0 = arith.constant 0 : index
    %0 = vector.load %arg0[%c0, %c0_0] : memref<8x48xf32, #tpu.memory_space<vmem>>, vector<8x48xf32>
    %1 = arith.truncf %0 : vector<8x48xf32> to vector<8x48xbf16>
    %c0_1 = arith.constant 0 : index
    %c0_2 = arith.constant 0 : index
    %2 = vector.load %arg1[%c0_1, %c0_2] : memref<48x128xbf16, #tpu.memory_space<vmem>>, vector<48x128xbf16>
    %cst = arith.constant dense<0.000000e+00> : vector<8x128xf32>
    %3 = tpu.matmul %1, %2, %cst {dimension_numbers = #tpu.dot_dimension_numbers<[1], [0], [0], [1], [0, 0, 1, 1], [], []>} : vector<8x48xbf16>, vector<48x128xbf16>, vector<8x128xf32> -> vector<8x128xf32>
    %c0_3 = arith.constant 0 : index
    %c0_4 = arith.constant 0 : index
    %4 = vector.load %arg3[%c0_3, %c0_4] : memref<1x128xf32, #tpu.memory_space<vmem>>, vector<1x128xf32>
    %5 = vector.broadcast %4 : vector<1x128xf32> to vector<8x128xf32>
    %6 = arith.addf %3, %5 : vector<8x128xf32>
    %c0_5 = arith.constant 0 : index
    %c0_6 = arith.constant 0 : index
    %7 = vector.load %arg2[%c0_5, %c0_6] : memref<32x128xbf16, #tpu.memory_space<vmem>>, vector<32x128xbf16>
    %cst_7 = arith.constant 0.000000e+00 : bf16
    %8 = vector.broadcast %cst_7 : bf16 to vector<1x32xbf16>
    %cst_8 = arith.constant 0.000000e+00 : f32
    %9 = vector.broadcast %cst_8 : f32 to vector<1x32xf32>
    %10 = vector.extract_strided_slice %6 {offsets = [0, 0], sizes = [1, 128], strides = [1, 1]} : vector<8x128xf32> to vector<1x128xf32>
    %cst_9 = arith.constant dense<0.000000e+00> : vector<1x128xf32>
    %11 = tpu.matmul %8, %7, %cst_9 {dimension_numbers = #tpu.dot_dimension_numbers<[1], [0], [0], [1], [0, 0, 1, 1], [], []>} : vector<1x32xbf16>, vector<32x128xbf16>, vector<1x128xf32> -> vector<1x128xf32>
    %12 = arith.addf %10, %11 : vector<1x128xf32>
    %13 = arith.negf %12 : vector<1x128xf32>
    %14 = math.exp %13 : vector<1x128xf32>
    %cst_10 = arith.constant 1.000000e+00 : f32
    %15 = vector.broadcast %cst_10 : f32 to vector<1x128xf32>
    %16 = arith.addf %15, %14 : vector<1x128xf32>
    %17 = arith.divf %15, %16 : vector<1x128xf32>
    %18 = math.tanh %12 : vector<1x128xf32>
    %19 = vector.extract_strided_slice %17 {offsets = [0, 0], sizes = [1, 32], strides = [1, 1]} : vector<1x128xf32> to vector<1x32xf32>
    %20 = vector.extract_strided_slice %17 {offsets = [0, 32], sizes = [1, 32], strides = [1, 1]} : vector<1x128xf32> to vector<1x32xf32>
    %21 = vector.extract_strided_slice %18 {offsets = [0, 64], sizes = [1, 32], strides = [1, 1]} : vector<1x128xf32> to vector<1x32xf32>
    %22 = vector.extract_strided_slice %17 {offsets = [0, 96], sizes = [1, 32], strides = [1, 1]} : vector<1x128xf32> to vector<1x32xf32>
    %23 = arith.mulf %20, %9 : vector<1x32xf32>
    %24 = arith.mulf %19, %21 : vector<1x32xf32>
    %25 = arith.addf %23, %24 : vector<1x32xf32>
    %26 = math.tanh %25 : vector<1x32xf32>
    %27 = arith.mulf %22, %26 : vector<1x32xf32>
    %28 = arith.truncf %27 : vector<1x32xf32> to vector<1x32xbf16>
    %29 = vector.extract_strided_slice %6 {offsets = [1, 0], sizes = [1, 128], strides = [1, 1]} : vector<8x128xf32> to vector<1x128xf32>
    %cst_11 = arith.constant dense<0.000000e+00> : vector<1x128xf32>
    %30 = tpu.matmul %28, %7, %cst_11 {dimension_numbers = #tpu.dot_dimension_numbers<[1], [0], [0], [1], [0, 0, 1, 1], [], []>} : vector<1x32xbf16>, vector<32x128xbf16>, vector<1x128xf32> -> vector<1x128xf32>
    %31 = arith.addf %29, %30 : vector<1x128xf32>
    %32 = arith.negf %31 : vector<1x128xf32>
    %33 = math.exp %32 : vector<1x128xf32>
    %cst_12 = arith.constant 1.000000e+00 : f32
    %34 = vector.broadcast %cst_12 : f32 to vector<1x128xf32>
    %35 = arith.addf %34, %33 : vector<1x128xf32>
    %36 = arith.divf %34, %35 : vector<1x128xf32>
    %37 = math.tanh %31 : vector<1x128xf32>
    %38 = vector.extract_strided_slice %36 {offsets = [0, 0], sizes = [1, 32], strides = [1, 1]} : vector<1x128xf32> to vector<1x32xf32>
    %39 = vector.extract_strided_slice %36 {offsets = [0, 32], sizes = [1, 32], strides = [1, 1]} : vector<1x128xf32> to vector<1x32xf32>
    %40 = vector.extract_strided_slice %37 {offsets = [0, 64], sizes = [1, 32], strides = [1, 1]} : vector<1x128xf32> to vector<1x32xf32>
    %41 = vector.extract_strided_slice %36 {offsets = [0, 96], sizes = [1, 32], strides = [1, 1]} : vector<1x128xf32> to vector<1x32xf32>
    %42 = arith.mulf %39, %25 : vector<1x32xf32>
    %43 = arith.mulf %38, %40 : vector<1x32xf32>
    %44 = arith.addf %42, %43 : vector<1x32xf32>
    %45 = math.tanh %44 : vector<1x32xf32>
    %46 = arith.mulf %41, %45 : vector<1x32xf32>
    %47 = arith.truncf %46 : vector<1x32xf32> to vector<1x32xbf16>
    %48 = vector.extract_strided_slice %6 {offsets = [2, 0], sizes = [1, 128], strides = [1, 1]} : vector<8x128xf32> to vector<1x128xf32>
    %cst_13 = arith.constant dense<0.000000e+00> : vector<1x128xf32>
    %49 = tpu.matmul %47, %7, %cst_13 {dimension_numbers = #tpu.dot_dimension_numbers<[1], [0], [0], [1], [0, 0, 1, 1], [], []>} : vector<1x32xbf16>, vector<32x128xbf16>, vector<1x128xf32> -> vector<1x128xf32>
    %50 = arith.addf %48, %49 : vector<1x128xf32>
    %51 = arith.negf %50 : vector<1x128xf32>
    %52 = math.exp %51 : vector<1x128xf32>
    %cst_14 = arith.constant 1.000000e+00 : f32
    %53 = vector.broadcast %cst_14 : f32 to vector<1x128xf32>
    %54 = arith.addf %53, %52 : vector<1x128xf32>
    %55 = arith.divf %53, %54 : vector<1x128xf32>
    %56 = math.tanh %50 : vector<1x128xf32>
    %57 = vector.extract_strided_slice %55 {offsets = [0, 0], sizes = [1, 32], strides = [1, 1]} : vector<1x128xf32> to vector<1x32xf32>
    %58 = vector.extract_strided_slice %55 {offsets = [0, 32], sizes = [1, 32], strides = [1, 1]} : vector<1x128xf32> to vector<1x32xf32>
    %59 = vector.extract_strided_slice %56 {offsets = [0, 64], sizes = [1, 32], strides = [1, 1]} : vector<1x128xf32> to vector<1x32xf32>
    %60 = vector.extract_strided_slice %55 {offsets = [0, 96], sizes = [1, 32], strides = [1, 1]} : vector<1x128xf32> to vector<1x32xf32>
    %61 = arith.mulf %58, %44 : vector<1x32xf32>
    %62 = arith.mulf %57, %59 : vector<1x32xf32>
    %63 = arith.addf %61, %62 : vector<1x32xf32>
    %64 = math.tanh %63 : vector<1x32xf32>
    %65 = arith.mulf %60, %64 : vector<1x32xf32>
    %66 = arith.truncf %65 : vector<1x32xf32> to vector<1x32xbf16>
    %67 = vector.extract_strided_slice %6 {offsets = [3, 0], sizes = [1, 128], strides = [1, 1]} : vector<8x128xf32> to vector<1x128xf32>
    %cst_15 = arith.constant dense<0.000000e+00> : vector<1x128xf32>
    %68 = tpu.matmul %66, %7, %cst_15 {dimension_numbers = #tpu.dot_dimension_numbers<[1], [0], [0], [1], [0, 0, 1, 1], [], []>} : vector<1x32xbf16>, vector<32x128xbf16>, vector<1x128xf32> -> vector<1x128xf32>
    %69 = arith.addf %67, %68 : vector<1x128xf32>
    %70 = arith.negf %69 : vector<1x128xf32>
    %71 = math.exp %70 : vector<1x128xf32>
    %cst_16 = arith.constant 1.000000e+00 : f32
    %72 = vector.broadcast %cst_16 : f32 to vector<1x128xf32>
    %73 = arith.addf %72, %71 : vector<1x128xf32>
    %74 = arith.divf %72, %73 : vector<1x128xf32>
    %75 = math.tanh %69 : vector<1x128xf32>
    %76 = vector.extract_strided_slice %74 {offsets = [0, 0], sizes = [1, 32], strides = [1, 1]} : vector<1x128xf32> to vector<1x32xf32>
    %77 = vector.extract_strided_slice %74 {offsets = [0, 32], sizes = [1, 32], strides = [1, 1]} : vector<1x128xf32> to vector<1x32xf32>
    %78 = vector.extract_strided_slice %75 {offsets = [0, 64], sizes = [1, 32], strides = [1, 1]} : vector<1x128xf32> to vector<1x32xf32>
    %79 = vector.extract_strided_slice %74 {offsets = [0, 96], sizes = [1, 32], strides = [1, 1]} : vector<1x128xf32> to vector<1x32xf32>
    %80 = arith.mulf %77, %63 : vector<1x32xf32>
    %81 = arith.mulf %76, %78 : vector<1x32xf32>
    %82 = arith.addf %80, %81 : vector<1x32xf32>
    %83 = math.tanh %82 : vector<1x32xf32>
    %84 = arith.mulf %79, %83 : vector<1x32xf32>
    %85 = arith.truncf %84 : vector<1x32xf32> to vector<1x32xbf16>
    %86 = vector.extract_strided_slice %6 {offsets = [4, 0], sizes = [1, 128], strides = [1, 1]} : vector<8x128xf32> to vector<1x128xf32>
    %cst_17 = arith.constant dense<0.000000e+00> : vector<1x128xf32>
    %87 = tpu.matmul %85, %7, %cst_17 {dimension_numbers = #tpu.dot_dimension_numbers<[1], [0], [0], [1], [0, 0, 1, 1], [], []>} : vector<1x32xbf16>, vector<32x128xbf16>, vector<1x128xf32> -> vector<1x128xf32>
    %88 = arith.addf %86, %87 : vector<1x128xf32>
    %89 = arith.negf %88 : vector<1x128xf32>
    %90 = math.exp %89 : vector<1x128xf32>
    %cst_18 = arith.constant 1.000000e+00 : f32
    %91 = vector.broadcast %cst_18 : f32 to vector<1x128xf32>
    %92 = arith.addf %91, %90 : vector<1x128xf32>
    %93 = arith.divf %91, %92 : vector<1x128xf32>
    %94 = math.tanh %88 : vector<1x128xf32>
    %95 = vector.extract_strided_slice %93 {offsets = [0, 0], sizes = [1, 32], strides = [1, 1]} : vector<1x128xf32> to vector<1x32xf32>
    %96 = vector.extract_strided_slice %93 {offsets = [0, 32], sizes = [1, 32], strides = [1, 1]} : vector<1x128xf32> to vector<1x32xf32>
    %97 = vector.extract_strided_slice %94 {offsets = [0, 64], sizes = [1, 32], strides = [1, 1]} : vector<1x128xf32> to vector<1x32xf32>
    %98 = vector.extract_strided_slice %93 {offsets = [0, 96], sizes = [1, 32], strides = [1, 1]} : vector<1x128xf32> to vector<1x32xf32>
    %99 = arith.mulf %96, %82 : vector<1x32xf32>
    %100 = arith.mulf %95, %97 : vector<1x32xf32>
    %101 = arith.addf %99, %100 : vector<1x32xf32>
    %102 = math.tanh %101 : vector<1x32xf32>
    %103 = arith.mulf %98, %102 : vector<1x32xf32>
    %104 = arith.truncf %103 : vector<1x32xf32> to vector<1x32xbf16>
    %105 = vector.extract_strided_slice %6 {offsets = [5, 0], sizes = [1, 128], strides = [1, 1]} : vector<8x128xf32> to vector<1x128xf32>
    %cst_19 = arith.constant dense<0.000000e+00> : vector<1x128xf32>
    %106 = tpu.matmul %104, %7, %cst_19 {dimension_numbers = #tpu.dot_dimension_numbers<[1], [0], [0], [1], [0, 0, 1, 1], [], []>} : vector<1x32xbf16>, vector<32x128xbf16>, vector<1x128xf32> -> vector<1x128xf32>
    %107 = arith.addf %105, %106 : vector<1x128xf32>
    %108 = arith.negf %107 : vector<1x128xf32>
    %109 = math.exp %108 : vector<1x128xf32>
    %cst_20 = arith.constant 1.000000e+00 : f32
    %110 = vector.broadcast %cst_20 : f32 to vector<1x128xf32>
    %111 = arith.addf %110, %109 : vector<1x128xf32>
    %112 = arith.divf %110, %111 : vector<1x128xf32>
    %113 = math.tanh %107 : vector<1x128xf32>
    %114 = vector.extract_strided_slice %112 {offsets = [0, 0], sizes = [1, 32], strides = [1, 1]} : vector<1x128xf32> to vector<1x32xf32>
    %115 = vector.extract_strided_slice %112 {offsets = [0, 32], sizes = [1, 32], strides = [1, 1]} : vector<1x128xf32> to vector<1x32xf32>
    %116 = vector.extract_strided_slice %113 {offsets = [0, 64], sizes = [1, 32], strides = [1, 1]} : vector<1x128xf32> to vector<1x32xf32>
    %117 = vector.extract_strided_slice %112 {offsets = [0, 96], sizes = [1, 32], strides = [1, 1]} : vector<1x128xf32> to vector<1x32xf32>
    %118 = arith.mulf %115, %101 : vector<1x32xf32>
    %119 = arith.mulf %114, %116 : vector<1x32xf32>
    %120 = arith.addf %118, %119 : vector<1x32xf32>
    %121 = math.tanh %120 : vector<1x32xf32>
    %122 = arith.mulf %117, %121 : vector<1x32xf32>
    %123 = arith.truncf %122 : vector<1x32xf32> to vector<1x32xbf16>
    %124 = vector.extract_strided_slice %6 {offsets = [6, 0], sizes = [1, 128], strides = [1, 1]} : vector<8x128xf32> to vector<1x128xf32>
    %cst_21 = arith.constant dense<0.000000e+00> : vector<1x128xf32>
    %125 = tpu.matmul %123, %7, %cst_21 {dimension_numbers = #tpu.dot_dimension_numbers<[1], [0], [0], [1], [0, 0, 1, 1], [], []>} : vector<1x32xbf16>, vector<32x128xbf16>, vector<1x128xf32> -> vector<1x128xf32>
    %126 = arith.addf %124, %125 : vector<1x128xf32>
    %127 = arith.negf %126 : vector<1x128xf32>
    %128 = math.exp %127 : vector<1x128xf32>
    %cst_22 = arith.constant 1.000000e+00 : f32
    %129 = vector.broadcast %cst_22 : f32 to vector<1x128xf32>
    %130 = arith.addf %129, %128 : vector<1x128xf32>
    %131 = arith.divf %129, %130 : vector<1x128xf32>
    %132 = math.tanh %126 : vector<1x128xf32>
    %133 = vector.extract_strided_slice %131 {offsets = [0, 0], sizes = [1, 32], strides = [1, 1]} : vector<1x128xf32> to vector<1x32xf32>
    %134 = vector.extract_strided_slice %131 {offsets = [0, 32], sizes = [1, 32], strides = [1, 1]} : vector<1x128xf32> to vector<1x32xf32>
    %135 = vector.extract_strided_slice %132 {offsets = [0, 64], sizes = [1, 32], strides = [1, 1]} : vector<1x128xf32> to vector<1x32xf32>
    %136 = vector.extract_strided_slice %131 {offsets = [0, 96], sizes = [1, 32], strides = [1, 1]} : vector<1x128xf32> to vector<1x32xf32>
    %137 = arith.mulf %134, %120 : vector<1x32xf32>
    %138 = arith.mulf %133, %135 : vector<1x32xf32>
    %139 = arith.addf %137, %138 : vector<1x32xf32>
    %140 = math.tanh %139 : vector<1x32xf32>
    %141 = arith.mulf %136, %140 : vector<1x32xf32>
    %142 = arith.truncf %141 : vector<1x32xf32> to vector<1x32xbf16>
    %143 = vector.extract_strided_slice %6 {offsets = [7, 0], sizes = [1, 128], strides = [1, 1]} : vector<8x128xf32> to vector<1x128xf32>
    %cst_23 = arith.constant dense<0.000000e+00> : vector<1x128xf32>
    %144 = tpu.matmul %142, %7, %cst_23 {dimension_numbers = #tpu.dot_dimension_numbers<[1], [0], [0], [1], [0, 0, 1, 1], [], []>} : vector<1x32xbf16>, vector<32x128xbf16>, vector<1x128xf32> -> vector<1x128xf32>
    %145 = arith.addf %143, %144 : vector<1x128xf32>
    %146 = arith.negf %145 : vector<1x128xf32>
    %147 = math.exp %146 : vector<1x128xf32>
    %cst_24 = arith.constant 1.000000e+00 : f32
    %148 = vector.broadcast %cst_24 : f32 to vector<1x128xf32>
    %149 = arith.addf %148, %147 : vector<1x128xf32>
    %150 = arith.divf %148, %149 : vector<1x128xf32>
    %151 = math.tanh %145 : vector<1x128xf32>
    %152 = vector.extract_strided_slice %150 {offsets = [0, 0], sizes = [1, 32], strides = [1, 1]} : vector<1x128xf32> to vector<1x32xf32>
    %153 = vector.extract_strided_slice %150 {offsets = [0, 32], sizes = [1, 32], strides = [1, 1]} : vector<1x128xf32> to vector<1x32xf32>
    %154 = vector.extract_strided_slice %151 {offsets = [0, 64], sizes = [1, 32], strides = [1, 1]} : vector<1x128xf32> to vector<1x32xf32>
    %155 = vector.extract_strided_slice %150 {offsets = [0, 96], sizes = [1, 32], strides = [1, 1]} : vector<1x128xf32> to vector<1x32xf32>
    %156 = arith.mulf %153, %139 : vector<1x32xf32>
    %157 = arith.mulf %152, %154 : vector<1x32xf32>
    %158 = arith.addf %156, %157 : vector<1x32xf32>
    %159 = math.tanh %158 : vector<1x32xf32>
    %160 = arith.mulf %155, %159 : vector<1x32xf32>
    %161 = arith.truncf %160 : vector<1x32xf32> to vector<1x32xbf16>
    %162 = tpu.concatenate %28, %47, %66, %85, %104, %123, %142, %161 in 0 : vector<1x32xbf16>, vector<1x32xbf16>, vector<1x32xbf16>, vector<1x32xbf16>, vector<1x32xbf16>, vector<1x32xbf16>, vector<1x32xbf16>, vector<1x32xbf16> -> vector<8x32xbf16>
    %c0_25 = arith.constant 0 : index
    %c0_26 = arith.constant 0 : index
    %163 = vector.load %arg4[%c0_25, %c0_26] : memref<32x3xbf16, #tpu.memory_space<vmem>>, vector<32x3xbf16>
    %cst_27 = arith.constant dense<0.000000e+00> : vector<8x3xf32>
    %164 = tpu.matmul %162, %163, %cst_27 {dimension_numbers = #tpu.dot_dimension_numbers<[1], [0], [0], [1], [0, 0, 1, 1], [], []>} : vector<8x32xbf16>, vector<32x3xbf16>, vector<8x3xf32> -> vector<8x3xf32>
    %c0_28 = arith.constant 0 : index
    %c0_29 = arith.constant 0 : index
    %165 = vector.load %arg5[%c0_28, %c0_29] : memref<1x3xf32, #tpu.memory_space<vmem>>, vector<1x3xf32>
    %166 = vector.broadcast %165 : vector<1x3xf32> to vector<8x3xf32>
    %167 = arith.addf %164, %166 : vector<8x3xf32>
    %c0_30 = arith.constant 0 : index
    %c0_31 = arith.constant 0 : index
    %168 = vector.load %arg6[%c0_30, %c0_31] : memref<8x3xf32, #tpu.memory_space<vmem>>, vector<8x3xf32>
    tpu.vector_store %arg6[%c0_30, %c0_31], %167 {strides = array<i32>} : memref<8x3xf32, #tpu.memory_space<vmem>>, vector<8x3xf32>,
    return
  }
}

</mosaic_0001>

<bundles_post_ra>
// kernel: lstm_pallas.1
= control target key start
LH: loop header
LB: loop body
LE: loop exit
PB: predicated region body
PF: predicated region fallthrough
CT: control target
= control target key end

     0   :  { %v816_v6 = vmov 0   ;;  %vm54_vm0 = vcmask 392192   ;;  %vm87_vm5 = vcmask 261120   ;;  %vm619_vm14 = vcmask 1040384   ;;  %s963_s1 = inlined_call_operand.vmem [shape: bf16[48,128], index: 1, kind: input, shape index: {}]   ;;  %s964_s2 = inlined_call_operand.vmem [shape: bf16[32,128], index: 2, kind: input, shape index: {}]   ;;  %s965_s0 = inlined_call_operand.vmem [shape: f32[8,48], index: 0, kind: input, shape index: {}]   ;;  %s966_s3 = inlined_call_operand.vmem [shape: f32[1,128], index: 3, kind: input, shape index: {}]   ;;  %s967_s4 = inlined_call_operand.vmem [shape: bf16[32,3], index: 4, kind: input, shape index: {}]   ;;  %s968_s5 = inlined_call_operand.vmem [shape: f32[1,3], index: 5, kind: input, shape index: {}]   ;;  %s969_s6 = inlined_call_operand.vmem [shape: f32[8,3], index: 6, kind: output, shape index: {}]  }
   0x1   :  { %v742_v0 = vld [vmem:[%s963_s1 + $0x10] sm:$0xff]  ;;  %v744_v1 = vld [vmem:[%s964_s2 + $0x8] sm:$0xff]  ;;  %v743_v3 = vld [vmem:[%s964_s2] sm:$0xff]  ;;  %s817_s2 = smov 64   ;;  %vm620_vm15 = vsmask.f32 256 }
   0x2   :  { %63 = vmatpush.bf16.msra.mxu0 %v742_v0  ;;  %97 = vmatpush.bf16.msra.mxu1 %v744_v1  ;;  %v741_v2 = vld [vmem:[%s963_s1 + $0x8] sm:$0xff]  ;;  %v740_v4 = vld [vmem:[%s963_s1] sm:$0xff] }
   0x3   :  { %157 = vmatpush.bf16.msra.mxu2 %v744_v1  ;;  %226 = vmatpush.bf16.msra.mxu3 %v744_v1  ;;  %v24_v5 = vld [vmem:[%s965_s0] sm:$0xff] }
   0x4   :  { %v25_v7 = vpack.c.bf16 %v24_v5, %v24_v5  ;;  %v750_v9 = vld [vmem:[%s966_s3] ss:$0 sm:$0xff]  ;;  %s818_s3 = smov 32  }
   0x6   :  { %64 = vmatpush.bf16.msra.mxu0 %v741_v2  ;;  %98 = vmatpush.bf16.msra.mxu1 %v743_v3 }
   0x7   :  { %158 = vmatpush.bf16.msra.mxu2 %v743_v3  ;;  %227 = vmatpush.bf16.msra.mxu3 %v743_v3 }
   0x9   :  { %99 = vmatmul.bf16.vlgmr.msra.gmra.mxu1 %v816_v6 }
   0xa   :  { %293 = vmatpush.bf16.msrb.mxu1 %v744_v1  ;;  %65 = vmatpush.bf16.msra.mxu0 %v740_v4 }
   0xb   :  { %363 = vmatpush.bf16.msrb.mxu2 %v744_v1  ;;  %430 = vmatpush.bf16.msrb.mxu3 %v744_v1 }
   0xd   :  { %707 = vmatmul.msk.bf16.vlgmr.msra.gmra.mxu0 %vm54_vm0, %v25_v7  ;;  %vm621_vm0 = vmand %vm619_vm14, %vm620_vm15 }
   0xe   :  { %500 = vmatpush.bf16.msrb.mxu0 %v744_v1  ;;  %294 = vmatpush.bf16.msrb.mxu1 %v743_v3 }
   0xf   :  { %364 = vmatpush.bf16.msrb.mxu2 %v743_v3  ;;  %431 = vmatpush.bf16.msrb.mxu3 %v743_v3 }
  0x12   :  { %567 = vmatpush.bf16.msra.mxu1 %v744_v1  ;;  %501 = vmatpush.bf16.msrb.mxu0 %v743_v3 }
  0x16   :  { %568 = vmatpush.bf16.msra.mxu1 %v743_v3 }
  0x86   :  { %v100_v8 = vpop.f32.mrf.mxu1 }
  0x8a   :  { %v67_v10 = vpop.f32.mrf.mxu0 }
  0x8b   :  { %v875_v11 = vadd.f32 %v750_v9, %v67_v10 }
  0x8d   :  { %v104_v12 = vadd.f32 %v100_v8, %v875_v11 }
  0x8e   :  { %v102_v13 = vpop.f32.mrf.mxu1 }
  0x8f   :  { %752 = vtanh.f32 %v104_v12  ;;  %v716_v16 = vmul.f32 -1.442695, %v104_v12 }
  0x91   :  { %754 = vpow2.f32 %v716_v16 }
  0x92   :  { %v69_v14 = vpop.f32.mrf.mxu0 }
  0x95   :  { %v753_v15 = vpop.eup %752 }
  0x96   :  { %127 = vrot.lane.b32.xlu0 %v753_v15, %s817_s2 }
  0x97   :  { %v755_v17 = vpop.eup %754 }
  0x98   :  { %v108_v18 = vadd.f32 1.0, %v755_v17 }
  0x9a   :  { %756 = vrcp.f32 %v108_v18  ;;  %v120_v24 = vand.u32 2147483648, %v108_v18  ;;  %vm114_vm2 = vweird.f32 %v108_v18  ;;  %v118_v25 = vand.u32 2147483647, %v108_v18 }
  0x9c   :  { %v121_v27 = vor.u32 1.1754944e-38, %v120_v24  ;;  %vm119_vm4 = vcmp.eq.f32.partialorder %v118_v25, 8.507059e+37 }
  0xa0   :  { %v757_v19 = vpop.eup %756 }
  0xa1   :  { %v110_v20 = vmul.f32 %v757_v19, %v108_v18  ;;  %vm115_vm1 = vweird.f32 %v757_v19 }
  0xa2   :  { %vm116_vm3 = vmor %vm114_vm2, %vm115_vm1 }
  0xa3   :  { %v111_v21 = vsub.f32 1.0, %v110_v20 }
  0xa5   :  { %v112_v22 = vmul.f32 %v757_v19, %v111_v21 }
  0xa7   :  { %v113_v23 = vadd.f32 %v757_v19, %v112_v22 }
  0xa9   :  { %v117_v26 = vsel %vm116_vm3, %v757_v19, %v113_v23 }
  0xaa   :  { %v122_v29 = vsel %vm119_vm4, %v121_v27, %v117_v26 }
  0xab   :  { %v125_v31 = vmul.f32 0.0, %v122_v29 }
 0x108   :  { %v128_v28 = vpop.permute.xlu0 %127 }
 0x109   :  { %v130_v30 = vmul.f32 %v128_v28, %v122_v29 }
 0x10b   :  { %132 = vrot.lane.b32.xlu0 %v130_v30, %s818_s3 }
 0x17d   :  { %v133_v32 = vpop.permute.xlu0 %132 }
 0x17e   :  { %v135_v33 = vadd.f32 %v133_v32, %v125_v31 }
 0x180   :  { %758 = vtanh.f32 %v135_v33  ;;  %v189_v61 = vrot.slane %v135_v33, 7 }
 0x186   :  { %v759_v34 = vpop.eup %758 }
 0x187   :  { %138 = vrot.lane.b32.xlu1 %v759_v34, %s817_s2 }
 0x1f9   :  { %v139_v35 = vpop.permute.xlu1 %138 }
 0x1fa   :  { %v141_v36 = vmul.f32 %v139_v35, %v122_v29 }
 0x1fc   :  { %v881_v37 = vpack.c.bf16 %v141_v36, %v141_v36 }
 0x1fe   :  { %v144_v38 = vunpack.c.l.b16 %v881_v37 }
 0x200   :  { %v145_v39 = vpack.c.b16 %v144_v38, %v144_v38 }
 0x202   :  { %146 = vrot.lane.b32.xlu1 %v145_v39, %s818_s3 }
 0x274   :  { %v147_v40 = vpop.permute.xlu1 %146 }
 0x275   :  { %717 = vmatmul.msk.bf16.vlgmr.msra.gmra.mxu2 %vm87_vm5, %v147_v40 }
 0x2f8   :  { %v160_v41 = vpop.f32.mrf.mxu2 }
 0x2f9   :  { %v165_v42 = vrot.slane %v160_v41, 7 }
 0x2fb   :  { %v167_v43 = vadd.f32 %v165_v42, %v875_v11 }
 0x2fd   :  { %760 = vtanh.f32 %v167_v43  ;;  %v718_v46 = vmul.f32 -1.442695, %v167_v43 }
 0x2ff   :  { %762 = vpow2.f32 %v718_v46 }
 0x300   :  { %v162_v44 = vpop.f32.mrf.mxu2 }
 0x303   :  { %v761_v45 = vpop.eup %760 }
 0x304   :  { %193 = vrot.lane.b32.xlu2 %v761_v45, %s817_s2 }
 0x305   :  { %v763_v47 = vpop.eup %762 }
 0x306   :  { %v171_v48 = vadd.f32 1.0, %v763_v47 }
 0x308   :  { %764 = vrcp.f32 %v171_v48  ;;  %v183_v54 = vand.u32 2147483648, %v171_v48  ;;  %vm177_vm7 = vweird.f32 %v171_v48  ;;  %v181_v55 = vand.u32 2147483647, %v171_v48 }
 0x30a   :  { %v184_v57 = vor.u32 1.1754944e-38, %v183_v54  ;;  %vm182_vm9 = vcmp.eq.f32.partialorder %v181_v55, 8.507059e+37 }
 0x30e   :  { %v765_v49 = vpop.eup %764 }
 0x30f   :  { %v173_v50 = vmul.f32 %v765_v49, %v171_v48  ;;  %vm178_vm6 = vweird.f32 %v765_v49 }
 0x310   :  { %vm179_vm8 = vmor %vm177_vm7, %vm178_vm6  ;;  %vm628_vm6 = vcmask 1041408   ;;  %vm629_vm7 = vsmask.f32 1280 }
 0x311   :  { %v174_v51 = vsub.f32 1.0, %v173_v50 }
 0x313   :  { %v175_v52 = vmul.f32 %v765_v49, %v174_v51 }
 0x315   :  { %v176_v53 = vadd.f32 %v765_v49, %v175_v52 }
 0x317   :  { %v180_v56 = vsel %vm179_vm8, %v765_v49, %v176_v53  ;;  %vm906_vm8 = vmand %vm628_vm6, %vm629_vm7 }
 0x318   :  { %v185_v59 = vsel %vm182_vm9, %v184_v57, %v180_v56 }
 0x319   :  { %v191_v62 = vmul.f32 %v189_v61, %v185_v59 }
 0x35e   :  { %v194_v58 = vpop.permute.xlu2 %193 }
 0x35f   :  { %v196_v60 = vmul.f32 %v194_v58, %v185_v59 }
 0x361   :  { %198 = vrot.lane.b32.xlu2 %v196_v60, %s818_s3 }
 0x3bb   :  { %v199_v63 = vpop.permute.xlu2 %198 }
 0x3bc   :  { %v201_v0 = vadd.f32 %v199_v63, %v191_v62 }
 0x3be   :  { %766 = vtanh.f32 %v201_v0  ;;  %v258_v30 = vrot.slane %v201_v0, 7 }
 0x3c4   :  { %v767_v1 = vpop.eup %766 }
 0x3c5   :  { %204 = vrot.lane.b32.xlu0 %v767_v1, %s817_s2 }
 0x437   :  { %v205_v2 = vpop.permute.xlu0 %204 }
 0x438   :  { %v207_v3 = vmul.f32 %v205_v2, %v185_v59 }
 0x43a   :  { %v208_v4 = vpack.c.bf16 %v207_v3, %v207_v3 }
 0x43c   :  { %v210_v5 = vunpack.c.l.b16 %v208_v4  ;;  %v622_v39 = vsel %vm621_vm0, %v881_v37, %v208_v4 }
 0x43e   :  { %v211_v6 = vpack.c.b16 %v210_v5, %v210_v5 }
 0x440   :  { %v213_v7 = vshrl.u32 %v211_v6, 16 }
 0x442   :  { %215 = vrot.lane.b32.xlu1 %v213_v7, %s818_s3 }
 0x4b4   :  { %v216_v8 = vpop.permute.xlu1 %215 }
 0x4b5   :  { %719 = vmatmul.msk.bf16.vlgmr.msra.gmra.mxu3 %vm87_vm5, %v216_v8 }
 0x538   :  { %v229_v9 = vpop.f32.mrf.mxu3 }
 0x539   :  { %v234_v10 = vrot.slane %v229_v9, 6 }
 0x53b   :  { %v236_v12 = vadd.f32 %v234_v10, %v875_v11 }
 0x53d   :  { %768 = vtanh.f32 %v236_v12  ;;  %v720_v15 = vmul.f32 -1.442695, %v236_v12 }
 0x53f   :  { %770 = vpow2.f32 %v720_v15 }
 0x540   :  { %v231_v13 = vpop.f32.mrf.mxu3 }
 0x543   :  { %v769_v14 = vpop.eup %768 }
 0x544   :  { %262 = vrot.lane.b32.xlu2 %v769_v14, %s817_s2 }
 0x545   :  { %v771_v16 = vpop.eup %770 }
 0x546   :  { %v240_v17 = vadd.f32 1.0, %v771_v16 }
 0x548   :  { %772 = vrcp.f32 %v240_v17  ;;  %v252_v23 = vand.u32 2147483648, %v240_v17  ;;  %vm246_vm11 = vweird.f32 %v240_v17  ;;  %v250_v24 = vand.u32 2147483647, %v240_v17 }
 0x54a   :  { %v253_v26 = vor.u32 1.1754944e-38, %v252_v23  ;;  %vm251_vm13 = vcmp.eq.f32.partialorder %v250_v24, 8.507059e+37 }
 0x54e   :  { %v773_v18 = vpop.eup %772 }
 0x54f   :  { %v242_v19 = vmul.f32 %v773_v18, %v240_v17  ;;  %vm247_vm10 = vweird.f32 %v773_v18 }
 0x550   :  { %vm248_vm12 = vmor %vm246_vm11, %vm247_vm10 }
 0x551   :  { %v243_v20 = vsub.f32 1.0, %v242_v19 }
 0x553   :  { %v244_v21 = vmul.f32 %v773_v18, %v243_v20 }
 0x555   :  { %v245_v22 = vadd.f32 %v773_v18, %v244_v21 }
 0x557   :  { %v249_v25 = vsel %vm248_vm12, %v773_v18, %v245_v22 }
 0x558   :  { %v254_v28 = vsel %vm251_vm13, %v253_v26, %v249_v25 }
 0x559   :  { %v260_v31 = vmul.f32 %v258_v30, %v254_v28 }
 0x59e   :  { %v263_v27 = vpop.permute.xlu2 %262 }
 0x59f   :  { %v265_v29 = vmul.f32 %v263_v27, %v254_v28 }
 0x5a1   :  { %267 = vrot.lane.b32.xlu0 %v265_v29, %s818_s3 }
 0x613   :  { %v268_v32 = vpop.permute.xlu0 %267 }
 0x614   :  { %v270_v33 = vadd.f32 %v268_v32, %v260_v31 }
 0x616   :  { %774 = vtanh.f32 %v270_v33  ;;  %v325_v0 = vrot.slane %v270_v33, 7 }
 0x61c   :  { %v775_v34 = vpop.eup %774 }
 0x61d   :  { %273 = vrot.lane.b32.xlu1 %v775_v34, %s817_s2 }
 0x68f   :  { %v274_v35 = vpop.permute.xlu1 %273 }
 0x690   :  { %v276_v36 = vmul.f32 %v274_v35, %v254_v28 }
 0x692   :  { %v277_v38 = vpack.c.bf16 %v276_v36, %v276_v36 }
 0x694   :  { %v279_v40 = vunpack.c.l.b16 %v277_v38  ;;  %v897_v41 = vsel %vm619_vm14, %v622_v39, %v277_v38 }
 0x696   :  { %v280_v42 = vpack.c.b16 %v279_v40, %v279_v40 }
 0x698   :  { %v281_v43 = vrot.slane %v280_v42, 1 }
 0x69a   :  { %282 = vrot.lane.b32.xlu2 %v281_v43, %s818_s3 }
 0x6f4   :  { %v283_v44 = vpop.permute.xlu2 %282 }
 0x6f5   :  { %721 = vmatmul.msk.bf16.vlgmr.msrb.gmra.mxu1 %vm87_vm5, %v283_v44 }
 0x772   :  { %v296_v45 = vpop.f32.mrf.mxu1 }
 0x773   :  { %v301_v46 = vrot.slane %v296_v45, 5 }
 0x775   :  { %v303_v47 = vadd.f32 %v301_v46, %v875_v11 }
 0x777   :  { %776 = vtanh.f32 %v303_v47  ;;  %v722_v37 = vmul.f32 -1.442695, %v303_v47 }
 0x779   :  { %778 = vpow2.f32 %v722_v37 }
 0x77a   :  { %v298_v48 = vpop.f32.mrf.mxu1 }
 0x77d   :  { %v777_v49 = vpop.eup %776 }
 0x77e   :  { %329 = vrot.lane.b32.xlu0 %v777_v49, %s817_s2 }
 0x77f   :  { %v779_v50 = vpop.eup %778 }
 0x780   :  { %v307_v51 = vadd.f32 1.0, %v779_v50 }
 0x782   :  { %780 = vrcp.f32 %v307_v51  ;;  %v319_v57 = vand.u32 2147483648, %v307_v51  ;;  %vm313_vm2 = vweird.f32 %v307_v51  ;;  %v317_v58 = vand.u32 2147483647, %v307_v51 }
 0x784   :  { %v320_v60 = vor.u32 1.1754944e-38, %v319_v57  ;;  %vm318_vm4 = vcmp.eq.f32.partialorder %v317_v58, 8.507059e+37 }
 0x788   :  { %v781_v52 = vpop.eup %780 }
 0x789   :  { %v309_v53 = vmul.f32 %v781_v52, %v307_v51  ;;  %vm314_vm1 = vweird.f32 %v781_v52 }
 0x78a   :  { %vm315_vm3 = vmor %vm313_vm2, %vm314_vm1  ;;  %vm637_vm1 = vcmask 1042432   ;;  %vm638_vm2 = vsmask.f32 2304 }
 0x78b   :  { %v310_v54 = vsub.f32 1.0, %v309_v53 }
 0x78d   :  { %v311_v55 = vmul.f32 %v781_v52, %v310_v54 }
 0x78f   :  { %v312_v56 = vadd.f32 %v781_v52, %v311_v55 }
 0x791   :  { %v316_v59 = vsel %vm315_vm3, %v781_v52, %v312_v56  ;;  %vm929_vm3 = vmand %vm637_vm1, %vm638_vm2 }
 0x792   :  { %v321_v62 = vsel %vm318_vm4, %v320_v60, %v316_v59 }
 0x793   :  { %v327_v1 = vmul.f32 %v325_v0, %v321_v62 }
 0x7f0   :  { %v330_v61 = vpop.permute.xlu0 %329 }
 0x7f1   :  { %v332_v63 = vmul.f32 %v330_v61, %v321_v62 }
 0x7f3   :  { %334 = vrot.lane.b32.xlu1 %v332_v63, %s818_s3 }
 0x865   :  { %v335_v2 = vpop.permute.xlu1 %334 }
 0x866   :  { %v337_v3 = vadd.f32 %v335_v2, %v327_v1 }
 0x868   :  { %782 = vtanh.f32 %v337_v3  ;;  %v395_v36 = vrot.slane %v337_v3, 7 }
 0x86e   :  { %v783_v4 = vpop.eup %782 }
 0x86f   :  { %340 = vrot.lane.b32.xlu2 %v783_v4, %s817_s2 }
 0x8c9   :  { %v341_v5 = vpop.permute.xlu2 %340 }
 0x8ca   :  { %v343_v6 = vmul.f32 %v341_v5, %v321_v62 }
 0x8cc   :  { %v344_v8 = vpack.c.bf16 %v343_v6, %v343_v6 }
 0x8ce   :  { %v346_v9 = vunpack.c.l.b16 %v344_v8  ;;  %v631_v10 = vsel %vm906_vm8, %v897_v41, %v344_v8 }
 0x8d0   :  { %v347_v12 = vpack.c.b16 %v346_v9, %v346_v9 }
 0x8d2   :  { %v349_v13 = vshrl.u32 %v347_v12, 16 }
 0x8d4   :  { %v351_v14 = vrot.slane %v349_v13, 1 }
 0x8d6   :  { %352 = vrot.lane.b32.xlu0 %v351_v14, %s818_s3 }
 0x948   :  { %v353_v15 = vpop.permute.xlu0 %352 }
 0x949   :  { %723 = vmatmul.msk.bf16.vlgmr.msrb.gmra.mxu2 %vm87_vm5, %v353_v15 }
 0x9cc   :  { %v366_v16 = vpop.f32.mrf.mxu2 }
 0x9cd   :  { %v371_v17 = vrot.slane %v366_v16, 4 }
 0x9cf   :  { %v373_v18 = vadd.f32 %v371_v17, %v875_v11 }
 0x9d1   :  { %784 = vtanh.f32 %v373_v18  ;;  %v724_v21 = vmul.f32 -1.442695, %v373_v18 }
 0x9d3   :  { %786 = vpow2.f32 %v724_v21 }
 0x9d4   :  { %v368_v19 = vpop.f32.mrf.mxu2 }
 0x9d7   :  { %v785_v20 = vpop.eup %784 }
 0x9d8   :  { %399 = vrot.lane.b32.xlu1 %v785_v20, %s817_s2 }
 0x9d9   :  { %v787_v22 = vpop.eup %786 }
 0x9da   :  { %v377_v23 = vadd.f32 1.0, %v787_v22 }
 0x9dc   :  { %788 = vrcp.f32 %v377_v23  ;;  %v389_v29 = vand.u32 2147483648, %v377_v23  ;;  %vm383_vm10 = vweird.f32 %v377_v23  ;;  %v387_v30 = vand.u32 2147483647, %v377_v23 }
 0x9de   :  { %v390_v32 = vor.u32 1.1754944e-38, %v389_v29  ;;  %vm388_vm12 = vcmp.eq.f32.partialorder %v387_v30, 8.507059e+37 }
 0x9e2   :  { %v789_v24 = vpop.eup %788 }
 0x9e3   :  { %v379_v25 = vmul.f32 %v789_v24, %v377_v23  ;;  %vm384_vm9 = vweird.f32 %v789_v24 }
 0x9e4   :  { %vm385_vm11 = vmor %vm383_vm10, %vm384_vm9 }
 0x9e5   :  { %v380_v26 = vsub.f32 1.0, %v379_v25 }
 0x9e7   :  { %v381_v27 = vmul.f32 %v789_v24, %v380_v26 }
 0x9e9   :  { %v382_v28 = vadd.f32 %v789_v24, %v381_v27 }
 0x9eb   :  { %v386_v31 = vsel %vm385_vm11, %v789_v24, %v382_v28 }
 0x9ec   :  { %v391_v34 = vsel %vm388_vm12, %v390_v32, %v386_v31 }
 0x9ed   :  { %v397_v38 = vmul.f32 %v395_v36, %v391_v34 }
 0xa4a   :  { %v400_v33 = vpop.permute.xlu1 %399 }
 0xa4b   :  { %v402_v35 = vmul.f32 %v400_v33, %v391_v34 }
 0xa4d   :  { %404 = vrot.lane.b32.xlu2 %v402_v35, %s818_s3 }
 0xaa7   :  { %v405_v39 = vpop.permute.xlu2 %404 }
 0xaa8   :  { %v407_v40 = vadd.f32 %v405_v39, %v397_v38 }
 0xaaa   :  { %790 = vtanh.f32 %v407_v40  ;;  %v462_v5 = vrot.slane %v407_v40, 7 }
 0xab0   :  { %v791_v41 = vpop.eup %790 }
 0xab1   :  { %410 = vrot.lane.b32.xlu0 %v791_v41, %s817_s2 }
 0xb23   :  { %v411_v42 = vpop.permute.xlu0 %410 }
 0xb24   :  { %v413_v43 = vmul.f32 %v411_v42, %v391_v34 }
 0xb26   :  { %v414_v44 = vpack.c.bf16 %v413_v43, %v413_v43 }
 0xb28   :  { %v416_v45 = vunpack.c.l.b16 %v414_v44  ;;  %v920_v46 = vsel %vm628_vm6, %v631_v10, %v414_v44 }
 0xb2a   :  { %v417_v47 = vpack.c.b16 %v416_v45, %v416_v45 }
 0xb2c   :  { %v418_v48 = vrot.slane %v417_v47, 2 }
 0xb2e   :  { %419 = vrot.lane.b32.xlu1 %v418_v48, %s818_s3 }
 0xba0   :  { %v420_v49 = vpop.permute.xlu1 %419 }
 0xba1   :  { %725 = vmatmul.msk.bf16.vlgmr.msrb.gmra.mxu3 %vm87_vm5, %v420_v49 }
 0xc24   :  { %v433_v37 = vpop.f32.mrf.mxu3 }
 0xc25   :  { %v438_v50 = vrot.slane %v433_v37, 3 }
 0xc27   :  { %v440_v51 = vadd.f32 %v438_v50, %v875_v11 }
 0xc29   :  { %792 = vtanh.f32 %v440_v51  ;;  %v726_v54 = vmul.f32 -1.442695, %v440_v51 }
 0xc2b   :  { %794 = vpow2.f32 %v726_v54 }
 0xc2c   :  { %v435_v52 = vpop.f32.mrf.mxu3 }
 0xc2f   :  { %v793_v53 = vpop.eup %792 }
 0xc30   :  { %466 = vrot.lane.b32.xlu2 %v793_v53, %s817_s2 }
 0xc31   :  { %v795_v55 = vpop.eup %794 }
 0xc32   :  { %v444_v56 = vadd.f32 1.0, %v795_v55 }
 0xc34   :  { %796 = vrcp.f32 %v444_v56  ;;  %v456_v62 = vand.u32 2147483648, %v444_v56  ;;  %vm450_vm14 = vweird.f32 %v444_v56  ;;  %v454_v63 = vand.u32 2147483647, %v444_v56 }
 0xc36   :  { %v457_v1 = vor.u32 1.1754944e-38, %v456_v62  ;;  %vm455_vm0 = vcmp.eq.f32.partialorder %v454_v63, 8.507059e+37 }
 0xc3a   :  { %v797_v57 = vpop.eup %796 }
 0xc3b   :  { %v446_v58 = vmul.f32 %v797_v57, %v444_v56  ;;  %vm451_vm13 = vweird.f32 %v797_v57 }
 0xc3c   :  { %vm452_vm15 = vmor %vm450_vm14, %vm451_vm13  ;;  %vm646_vm13 = vcmask 1043456   ;;  %vm647_vm14 = vsmask.f32 3328 }
 0xc3d   :  { %v447_v59 = vsub.f32 1.0, %v446_v58 }
 0xc3f   :  { %v448_v60 = vmul.f32 %v797_v57, %v447_v59 }
 0xc41   :  { %v449_v61 = vadd.f32 %v797_v57, %v448_v60 }
 0xc43   :  { %v453_v0 = vsel %vm452_vm15, %v797_v57, %v449_v61  ;;  %vm648_vm15 = vmand %vm646_vm13, %vm647_vm14 }
 0xc44   :  { %v458_v3 = vsel %vm455_vm0, %v457_v1, %v453_v0  ;;  %vm689_vm0 = vcmask 23552  }
 0xc45   :  { %v464_v6 = vmul.f32 %v462_v5, %v458_v3 }
 0xc8a   :  { %v467_v2 = vpop.permute.xlu2 %466 }
 0xc8b   :  { %v469_v4 = vmul.f32 %v467_v2, %v458_v3 }
 0xc8d   :  { %471 = vrot.lane.b32.xlu0 %v469_v4, %s818_s3 }
 0xcff   :  { %v472_v7 = vpop.permute.xlu0 %471 }
 0xd00   :  { %v474_v8 = vadd.f32 %v472_v7, %v464_v6 }
 0xd02   :  { %798 = vtanh.f32 %v474_v8  ;;  %v532_v42 = vrot.slane %v474_v8, 7 }
 0xd08   :  { %v799_v9 = vpop.eup %798 }
 0xd09   :  { %477 = vrot.lane.b32.xlu1 %v799_v9, %s817_s2 }
 0xd7b   :  { %v478_v10 = vpop.permute.xlu1 %477 }
 0xd7c   :  { %v480_v12 = vmul.f32 %v478_v10, %v458_v3 }
 0xd7e   :  { %v481_v14 = vpack.c.bf16 %v480_v12, %v480_v12 }
 0xd80   :  { %v483_v15 = vunpack.c.l.b16 %v481_v14  ;;  %v640_v16 = vsel %vm929_vm3, %v920_v46, %v481_v14 }
 0xd82   :  { %v484_v17 = vpack.c.b16 %v483_v15, %v483_v15  ;;  %v746_v15 = vld [vmem:[%s967_s4 + $0x8] sm:$0xff] }
 0xd83   :  { %682 = vmatpush.bf16.msra.mxu2 %v746_v15 }
 0xd84   :  { %v486_v18 = vshrl.u32 %v484_v17, 16 }
 0xd86   :  { %v488_v19 = vrot.slane %v486_v18, 2 }
 0xd88   :  { %489 = vrot.lane.b32.xlu2 %v488_v19, %s818_s3 }
 0xde2   :  { %v490_v20 = vpop.permute.xlu2 %489 }
 0xde3   :  { %727 = vmatmul.msk.bf16.vlgmr.msrb.gmra.mxu0 %vm87_vm5, %v490_v20 }
 0xe60   :  { %v503_v21 = vpop.f32.mrf.mxu0 }
 0xe61   :  { %v508_v22 = vrot.slane %v503_v21, 2 }
 0xe63   :  { %v510_v23 = vadd.f32 %v508_v22, %v875_v11  ;;  %v751_v22 = vld [vmem:[%s968_s5] ss:$0 sm:$0xff] }
 0xe65   :  { %800 = vtanh.f32 %v510_v23  ;;  %v728_v26 = vmul.f32 -1.442695, %v510_v23 }
 0xe67   :  { %802 = vpow2.f32 %v728_v26 }
 0xe68   :  { %v505_v24 = vpop.f32.mrf.mxu0 }
 0xe6b   :  { %v801_v25 = vpop.eup %800 }
 0xe6c   :  { %536 = vrot.lane.b32.xlu0 %v801_v25, %s817_s2 }
 0xe6d   :  { %v803_v27 = vpop.eup %802 }
 0xe6e   :  { %v514_v28 = vadd.f32 1.0, %v803_v27 }
 0xe70   :  { %804 = vrcp.f32 %v514_v28  ;;  %v526_v34 = vand.u32 2147483648, %v514_v28  ;;  %vm520_vm6 = vweird.f32 %v514_v28  ;;  %v524_v35 = vand.u32 2147483647, %v514_v28 }
 0xe72   :  { %v527_v38 = vor.u32 1.1754944e-38, %v526_v34  ;;  %vm525_vm8 = vcmp.eq.f32.partialorder %v524_v35, 8.507059e+37 }
 0xe76   :  { %v805_v29 = vpop.eup %804 }
 0xe77   :  { %v516_v30 = vmul.f32 %v805_v29, %v514_v28  ;;  %vm521_vm4 = vweird.f32 %v805_v29 }
 0xe78   :  { %vm522_vm7 = vmor %vm520_vm6, %vm521_vm4 }
 0xe79   :  { %v517_v31 = vsub.f32 1.0, %v516_v30 }
 0xe7b   :  { %v518_v32 = vmul.f32 %v805_v29, %v517_v31 }
 0xe7d   :  { %v519_v33 = vadd.f32 %v805_v29, %v518_v32 }
 0xe7f   :  { %v523_v36 = vsel %vm522_vm7, %v805_v29, %v519_v33 }
 0xe80   :  { %v528_v40 = vsel %vm525_vm8, %v527_v38, %v523_v36 }
 0xe81   :  { %v534_v43 = vmul.f32 %v532_v42, %v528_v40 }
 0xede   :  { %v537_v39 = vpop.permute.xlu0 %536 }
 0xedf   :  { %v539_v41 = vmul.f32 %v537_v39, %v528_v40 }
 0xee1   :  { %541 = vrot.lane.b32.xlu1 %v539_v41, %s818_s3 }
 0xf53   :  { %v542_v44 = vpop.permute.xlu1 %541 }
 0xf54   :  { %v544_v45 = vadd.f32 %v542_v44, %v534_v43 }
 0xf56   :  { %806 = vtanh.f32 %v544_v45  ;;  %v599_v9 = vrot.slane %v544_v45, 7 }
 0xf5c   :  { %v807_v46 = vpop.eup %806 }
 0xf5d   :  { %547 = vrot.lane.b32.xlu2 %v807_v46, %s817_s2 }
 0xfb7   :  { %v548_v47 = vpop.permute.xlu2 %547 }
 0xfb8   :  { %v550_v48 = vmul.f32 %v548_v47, %v528_v40 }
 0xfba   :  { %v551_v49 = vpack.c.bf16 %v550_v48, %v550_v48 }
 0xfbc   :  { %v553_v37 = vunpack.c.l.b16 %v551_v49  ;;  %v644_v50 = vsel %vm637_vm1, %v640_v16, %v551_v49  ;;  %v745_v16 = vld [vmem:[%s967_s4] sm:$0xff] }
 0xfbd   :  { %683 = vmatpush.bf16.msra.mxu2 %v745_v16 }
 0xfbe   :  { %v554_v51 = vpack.c.b16 %v553_v37, %v553_v37 }
 0xfc0   :  { %v555_v52 = vrot.slane %v554_v51, 3 }
 0xfc2   :  { %556 = vrot.lane.b32.xlu0 %v555_v52, %s818_s3 }
0x1034   :  { %v557_v53 = vpop.permute.xlu0 %556 }
0x1035   :  { %729 = vmatmul.msk.bf16.vlgmr.msra.gmra.mxu1 %vm87_vm5, %v557_v53 }
0x10b2   :  { %v570_v54 = vpop.f32.mrf.mxu1 }
0x10b3   :  { %v575_v55 = vrot.slane %v570_v54, 1 }
0x10b5   :  { %v577_v56 = vadd.f32 %v575_v55, %v875_v11 }
0x10b7   :  { %808 = vtanh.f32 %v577_v56  ;;  %v730_v59 = vmul.f32 -1.442695, %v577_v56 }
0x10b9   :  { %810 = vpow2.f32 %v730_v59 }
0x10ba   :  { %v572_v57 = vpop.f32.mrf.mxu1 }
0x10bd   :  { %v809_v58 = vpop.eup %808 }
0x10be   :  { %603 = vrot.lane.b32.xlu1 %v809_v58, %s817_s2 }
0x10bf   :  { %v811_v60 = vpop.eup %810 }
0x10c0   :  { %v581_v61 = vadd.f32 1.0, %v811_v60 }
0x10c2   :  { %812 = vrcp.f32 %v581_v61  ;;  %v593_v3 = vand.u32 2147483648, %v581_v61  ;;  %vm587_vm10 = vweird.f32 %v581_v61  ;;  %v591_v4 = vand.u32 2147483647, %v581_v61 }
0x10c4   :  { %v594_v5 = vor.u32 1.1754944e-38, %v593_v3  ;;  %vm592_vm12 = vcmp.eq.f32.partialorder %v591_v4, 8.507059e+37 }
0x10c8   :  { %v813_v62 = vpop.eup %812 }
0x10c9   :  { %v583_v63 = vmul.f32 %v813_v62, %v581_v61  ;;  %vm588_vm9 = vweird.f32 %v813_v62 }
0x10ca   :  { %vm589_vm11 = vmor %vm587_vm10, %vm588_vm9 }
0x10cb   :  { %v584_v0 = vsub.f32 1.0, %v583_v63 }
0x10cd   :  { %v585_v1 = vmul.f32 %v813_v62, %v584_v0 }
0x10cf   :  { %v586_v2 = vadd.f32 %v813_v62, %v585_v1 }
0x10d1   :  { %v590_v11 = vsel %vm589_vm11, %v813_v62, %v586_v2 }
0x10d2   :  { %v595_v7 = vsel %vm592_vm12, %v594_v5, %v590_v11 }
0x10d3   :  { %v601_v10 = vmul.f32 %v599_v9, %v595_v7 }
0x1130   :  { %v604_v6 = vpop.permute.xlu1 %603 }
0x1131   :  { %v606_v8 = vmul.f32 %v604_v6, %v595_v7 }
0x1133   :  { %608 = vrot.lane.b32.xlu2 %v606_v8, %s818_s3 }
0x118d   :  { %v609_v12 = vpop.permute.xlu2 %608 }
0x118e   :  { %v611_v13 = vadd.f32 %v609_v12, %v601_v10 }
0x1190   :  { %814 = vtanh.f32 %v611_v13 }
0x1196   :  { %v815_v14 = vpop.eup %814 }
0x1197   :  { %614 = vrot.lane.b32.xlu0 %v815_v14, %s817_s2 }
0x1209   :  { %v615_v17 = vpop.permute.xlu0 %614 }
0x120a   :  { %v617_v18 = vmul.f32 %v615_v17, %v595_v7 }
0x120c   :  { %v618_v19 = vpack.c.bf16 %v617_v18, %v617_v18 }
0x120e   :  { %v649_v20 = vsel %vm648_vm15, %v644_v50, %v618_v19 }
0x120f   :  { %659 = vrot.lane.b32.xlu1 %v649_v20, %s818_s3 }
0x1281   :  { %v660_v21 = vpop.permute.xlu1 %659 }
0x1282   :  { %739 = vmatmul.msk.bf16.vlgmr.msra.gmra.mxu2 %vm87_vm5, %v660_v21 }
0x1305   :  { %v685_v23 = vpop.f32.mrf.mxu2 }
0x1306   :  { %v686_v24 = vadd.f32 %v751_v22, %v685_v23 }
0x1308   :  { %690 = vst.msk [vmem:[%s969_s6] sm:$0xff] %vm689_vm0, %v686_v24 }
0x130d   :  { %v687_v25 = vpop.f32.mrf.mxu2 }

</bundles_post_ra>
